<compile_context>
chip_gen: v6e
topology: v6e:2x2x1
jax: 0.10.0
libtpu: 0.0.40
codegen_flags: <defaults>
</compile_context>

<pallas_src>
import functools

import numpy as np
import jax
import jax.numpy as jnp
from jax.experimental import pallas as pl
from jax.experimental.pallas import tpu as pltpu


# --------------------------------------------------------------------------- kernel ---

def _task_partial_sums(x_ref, lab_ref, w_ref, row_valid):
    """Weighted-CE partial sums for one task over one row tile.

    Returns (num, den), both (1, C) float32:
      num[c] = sum_{rows i in tile with y_i == c} w[c] * (logsumexp(x_i) - x_i[c])
      den[c] = sum_{rows i in tile with y_i == c} w[c]
    Only cheap sublane (axis=0) reductions happen here; the cross-lane reduce and the
    divides are done once, outside the grid loop.
    """
    x = x_ref[...].astype(jnp.float32)                     # (tile_n, C)
    x = jnp.where(row_valid, x, 0.0)                       # keep padded/garbage rows finite
    w = w_ref[...].astype(jnp.float32)                     # (1, C)

    # Labels arrive lane-dense as (1, tile_n); move them to a column for the compare.
    lab_col = jnp.transpose(lab_ref[...], (1, 0))          # (tile_n, 1) int32
    cls_idx = jax.lax.broadcasted_iota(jnp.int32, x.shape, 1)
    eq = (cls_idx == lab_col) & row_valid                  # one-hot over valid rows

    # Numerically-stable logsumexp per row.
    m = jnp.max(x, axis=-1, keepdims=True)                 # (tile_n, 1)
    lse = m + jnp.log(jnp.sum(jnp.exp(x - m), axis=-1, keepdims=True))

    w_sel = jnp.where(eq, w, 0.0)                          # w[y_i] at (i, y_i), else 0
    # Select BEFORE the weight multiply so +/-inf logits in non-label classes
    # (e.g. -inf class masking) never form 0 * inf = NaN.
    contrib = jnp.where(eq, w * (lse - x), 0.0)
    num = jnp.sum(contrib, axis=0, keepdims=True)          # (1, C) sublane-only reduce
    den = jnp.sum(w_sel, axis=0, keepdims=True)            # (1, C)
    return num, den


def _multi_task_loss_kernel(vx_ref, vl_ref, vw_ref,
                            tx_ref, tl_ref, tw_ref,
                            num_v_ref, den_v_ref, num_t_ref, den_t_ref,
                            *, n_rows, tile_n, steps_per_slice):
    s = pl.program_id(0)      # row-range slice ("parallel": one per v7x TensorCore)
    j = pl.program_id(1)      # steps within the slice ("arbitrary" reduction axis)

    @pl.when(j == 0)
    def _init():
        num_v_ref[...] = jnp.zeros_like(num_v_ref)
        den_v_ref[...] = jnp.zeros_like(den_v_ref)
        num_t_ref[...] = jnp.zeros_like(num_t_ref)
        den_t_ref[...] = jnp.zeros_like(den_t_ref)

    # Unclamped global tile index: steps past the end of the row range (uneven slice
    # split / ragged last tile) get an all-False mask and contribute exactly zero.
    tile_idx = s * steps_per_slice + j
    row_iota = jax.lax.broadcasted_iota(jnp.int32, (tile_n, 1), 0)
    row_valid = (tile_idx * tile_n + row_iota) < n_rows    # (tile_n, 1) bool

    num_v, den_v = _task_partial_sums(vx_ref, vl_ref, vw_ref, row_valid)
    num_t, den_t = _task_partial_sums(tx_ref, tl_ref, tw_ref, row_valid)
    num_v_ref[...] += num_v[None]
    den_v_ref[...] += den_v[None]
    num_t_ref[...] += num_t[None]
    den_t_ref[...] += den_t[None]


# ------------------------------------------------------------------------- planning ---

def _cdiv(a, b):
    return -(-a // b)


def _round_up(x, m):
    return ((x + m - 1) // m) * m


@functools.lru_cache(maxsize=None)
def _physical_vmem_bytes():
    try:
        vmem = int(pltpu.get_tpu_info().vmem_capacity_bytes)
        if vmem > 0:
            return vmem
    except Exception:
        pass
    return 64 * 1024 * 1024   # v7x (smallest physical VMEM) => safe everywhere


def _plan(n_rows, c_v, c_t, isz_v, isz_t, max_tile_rows=None):
    """Pick (tile_n, num_slices, steps_per_slice, total_tiles, vmem_limit_bytes)."""
    phys = _physical_vmem_bytes()
    # ~54 MiB of tiles on v5e/v6e (128 MiB physical), ~27 MiB on v7x (64 MiB physical).
    budget = int(phys * 0.42)
    cvp = _round_up(max(c_v, 1), 128)        # lane padding is what actually sits in VMEM
    ctp = _round_up(max(c_t, 1), 128)
    per_row = (
        2 * cvp * isz_v                      # verb logits tile, double buffered
        + 2 * ctp * isz_t                    # target logits tile, double buffered
        + 2 * 2 * 8 * 4                      # two (1, tile_n) i32 label rows (8-sublane pad), x2 buffers
        + 3 * 4 * (cvp + ctp)                # f32 in-kernel working-set headroom
    )
    tile = max(budget // per_row, 128)       # TODO(synk): class-dim tiling for huge-C heads
    if max_tile_rows is not None:
        tile = min(tile, int(max_tile_rows))
    tile = min(tile, 16384)

    if tile >= n_rows:
        tile_n = n_rows                      # single full-extent tile (always legal)
    else:
        # Multiple of 128 keeps the lane-dense (1, tile_n) label blocks and the
        # sublane-packed bf16/int8 logits blocks aligned.
        tile_n = max((tile // 128) * 128, 128)
        if tile_n >= n_rows:
            tile_n = n_rows

    total_tiles = _cdiv(n_rows, tile_n)
    num_slices = 2 if total_tiles >= 2 else 1          # one row range per v7x TensorCore
    steps_per_slice = _cdiv(total_tiles, num_slices)
    vmem_limit = int(phys * 0.8)
    return tile_n, num_slices, steps_per_slice, total_tiles, vmem_limit


# -------------------------------------------------------------------------- wrapper ---

@functools.partial(jax.jit, static_argnames=("max_tile_rows",))
def multi_task_loss(verb_preds, target_preds, verb_labels, target_labels,
                    verb_weights, target_weights, *, max_tile_rows=None):
    """Pallas implementation of MultiTaskLoss.forward (weighted CE + weighted CE)."""
    n, c_v = verb_preds.shape
    n_t, c_t = target_preds.shape
    assert n == n_t, "both tasks must share the batch dimension"

    tile_n, num_slices, steps_per_slice, total_tiles, vmem_limit = _plan(
        n, c_v, c_t,
        jnp.dtype(verb_preds.dtype).itemsize,
        jnp.dtype(target_preds.dtype).itemsize,
        max_tile_rows=max_tile_rows)

    # Lane-dense labels: (1, N) int32 — no (N, 1) relayout, ~4 B of label HBM per row.
    vl = verb_labels.astype(jnp.int32).reshape(1, n)
    tl = target_labels.astype(jnp.int32).reshape(1, n)
    vw = verb_weights.astype(jnp.float32).reshape(1, c_v)
    tw = target_weights.astype(jnp.float32).reshape(1, c_t)

    last_tile = total_tiles - 1

    def row_block(s, j):
        return (jnp.minimum(s * steps_per_slice + j, last_tile), 0)

    def lab_block(s, j):
        return (0, jnp.minimum(s * steps_per_slice + j, last_tile))

    kernel = functools.partial(_multi_task_loss_kernel, n_rows=n, tile_n=tile_n,
                               steps_per_slice=steps_per_slice)

    num_v, den_v, num_t, den_t = pl.pallas_call(
        kernel,
        out_shape=(
            jax.ShapeDtypeStruct((num_slices, 1, c_v), jnp.float32),
            jax.ShapeDtypeStruct((num_slices, 1, c_v), jnp.float32),
            jax.ShapeDtypeStruct((num_slices, 1, c_t), jnp.float32),
            jax.ShapeDtypeStruct((num_slices, 1, c_t), jnp.float32),
        ),
        grid_spec=pltpu.PrefetchScalarGridSpec(
            num_scalar_prefetch=0,
            grid=(num_slices, steps_per_slice),
            in_specs=[
                pl.BlockSpec((tile_n, c_v), row_block),        # verb logits
                pl.BlockSpec((1, tile_n), lab_block),          # verb labels (lane-dense)
                pl.BlockSpec((1, c_v), lambda s, j: (0, 0)),   # verb class weights
                pl.BlockSpec((tile_n, c_t), row_block),        # target logits
                pl.BlockSpec((1, tile_n), lab_block),          # target labels (lane-dense)
                pl.BlockSpec((1, c_t), lambda s, j: (0, 0)),   # target class weights
            ],
            out_specs=[
                pl.BlockSpec((1, 1, c_v), lambda s, j: (s, 0, 0)),   # per-slice num_verb
                pl.BlockSpec((1, 1, c_v), lambda s, j: (s, 0, 0)),   # per-slice den_verb
                pl.BlockSpec((1, 1, c_t), lambda s, j: (s, 0, 0)),   # per-slice num_target
                pl.BlockSpec((1, 1, c_t), lambda s, j: (s, 0, 0)),   # per-slice den_target
            ],
        ),
        compiler_params=pltpu.CompilerParams(
            # TODO(synk): could mark the slice axis pltpu.CORE_PARALLEL on v7x; plain
            # "parallel" already allows the megacore to shard it across TensorCores.
            dimension_semantics=("parallel", "arbitrary"),
            vmem_limit_bytes=vmem_limit),
    )(verb_preds, vl, vw, target_preds, tl, tw)

    # Tiny cross-lane / cross-slice combine + the two divides (a few scalar FLOPs).
    # Division by zero (all selected weights zero) gives NaN, same as PyTorch.
    return jnp.sum(num_v) / jnp.sum(den_v) + jnp.sum(num_t) / jnp.sum(den_t)


# ------------------------------------------------------------------ reference & test ---

def _ce_ref(logits, labels, weights):
    """Pure-JAX reference matching torch.nn.CrossEntropyLoss(weight=...)."""
    logp = jax.nn.log_softmax(logits.astype(jnp.float32), axis=-1)
    nll = -jnp.take_along_axis(logp, labels[:, None].astype(jnp.int32), axis=-1)[:, 0]
    w = weights[labels]
    return jnp.sum(w * nll) / jnp.sum(w)


def _make_normalized_weights(num_classes, scaling_factor=0.5, seed=1):
    """Deterministic synthetic class weights mimicking the 1/freq**s normalization
    MultiTaskLoss.__init__ derives from config.task_class_frequencies."""
    rng = np.random.RandomState(seed)
    freqs = rng.uniform(10.0, 1000.0, size=(num_classes,)).astype(np.float64)
    w = np.where(freqs > 0, 1.0 / freqs ** scaling_factor, 0.0)
    w = w / w.sum()
    return jnp.asarray(w, dtype=jnp.float32)


if __name__ == "__main__":
    # Primary small test: batch of 8, 10 verb classes, 15 target classes.
    N, C_VERB, C_TARGET = 8, 10, 15

    key = jax.random.PRNGKey(0)
    k1, k2, k3, k4, k5, k6, k7, k8 = jax.random.split(key, 8)
    verb_preds = jax.random.normal(k1, (N, C_VERB), dtype=jnp.float32)
    target_preds = jax.random.normal(k2, (N, C_TARGET), dtype=jnp.float32)
    verb_labels = jax.random.randint(k3, (N,), 0, C_VERB, dtype=jnp.int32)
    target_labels = jax.random.randint(k4, (N,), 0, C_TARGET, dtype=jnp.int32)

    # use_wce=True path: deterministic normalized class weights built in-script.
    verb_weights = _make_normalized_weights(C_VERB, scaling_factor=0.5, seed=1)
    target_weights = _make_normalized_weights(C_TARGET, scaling_factor=0.5, seed=2)

    loss = multi_task_loss(verb_preds, target_preds, verb_labels, target_labels,
                           verb_weights, target_weights)
    loss = jax.block_until_ready(loss)
    ref = (_ce_ref(verb_preds, verb_labels, verb_weights)
           + _ce_ref(target_preds, target_labels, target_weights))
    ref = jax.block_until_ready(ref)
    np.testing.assert_allclose(np.asarray(loss), np.asarray(ref), rtol=1e-5, atol=1e-5)

    # Secondary check: exercises the multi-tile / two-slice path with a ragged last tile
    # and an uneven slice split (ceil(1100/256)=5 tiles over 2 slices).
    N2 = 1100
    vp2 = jax.random.normal(k5, (N2, C_VERB), dtype=jnp.float32)
    tp2 = jax.random.normal(k6, (N2, C_TARGET), dtype=jnp.float32)
    vlab2 = jax.random.randint(k7, (N2,), 0, C_VERB, dtype=jnp.int32)
    tlab2 = jax.random.randint(k8, (N2,), 0, C_TARGET, dtype=jnp.int32)
    loss2 = multi_task_loss(vp2, tp2, vlab2, tlab2, verb_weights, target_weights,
                            max_tile_rows=256)
    loss2 = jax.block_until_ready(loss2)
    ref2 = (_ce_ref(vp2, vlab2, verb_weights) + _ce_ref(tp2, tlab2, target_weights))
    ref2 = jax.block_until_ready(ref2)
    np.testing.assert_allclose(np.asarray(loss2), np.asarray(ref2), rtol=3e-5, atol=1e-5)

    print("KERNEL_OK")
</pallas_src>

<mosaic_0001>
module attributes {stable_mosaic.version = 11 : i64} {
  func.func @_multi_task_loss_kernel(%arg0: i32, %arg1: i32, %arg2: memref<8x10xf32, #tpu.memory_space<vmem>>, %arg3: memref<1x8xi32, #tpu.memory_space<vmem>>, %arg4: memref<1x10xf32, #tpu.memory_space<vmem>>, %arg5: memref<8x15xf32, #tpu.memory_space<vmem>>, %arg6: memref<1x8xi32, #tpu.memory_space<vmem>>, %arg7: memref<1x15xf32, #tpu.memory_space<vmem>>, %arg8: memref<1x1x10xf32, #tpu.memory_space<vmem>>, %arg9: memref<1x1x10xf32, #tpu.memory_space<vmem>>, %arg10: memref<1x1x15xf32, #tpu.memory_space<vmem>>, %arg11: memref<1x1x15xf32, #tpu.memory_space<vmem>>) attributes {dimension_semantics = [#tpu.dimension_semantics<parallel>, #tpu.dimension_semantics<arbitrary>], iteration_bounds = array<i64: 1, 1>, scalar_prefetch = 0 : i64, scratch_operands = 0 : i64, tpu.core_type = #tpu.core_type<tc>, window_params = [{transform_indices = @transform_0, window_bounds = array<i64: 8, 10>}, {transform_indices = @transform_1, window_bounds = array<i64: 1, 8>}, {pipeline_mode = #tpu.pipeline_mode<synchronous>, transform_indices = @transform_2, window_bounds = array<i64: 1, 10>}, {transform_indices = @transform_3, window_bounds = array<i64: 8, 15>}, {transform_indices = @transform_4, window_bounds = array<i64: 1, 8>}, {pipeline_mode = #tpu.pipeline_mode<synchronous>, transform_indices = @transform_5, window_bounds = array<i64: 1, 15>}, {transform_indices = @transform_6, window_bounds = array<i64: 1, 1, 10>}, {transform_indices = @transform_7, window_bounds = array<i64: 1, 1, 10>}, {transform_indices = @transform_8, window_bounds = array<i64: 1, 1, 15>}, {transform_indices = @transform_9, window_bounds = array<i64: 1, 1, 15>}]} {
    %c0_i32 = arith.constant 0 : i32
    %0 = arith.cmpi eq, %arg1, %c0_i32 : i32
    %1 = arith.extui %0 : i1 to i32
    %c0_i32_0 = arith.constant 0 : i32
    %2 = arith.cmpi ne, %1, %c0_i32_0 : i32
    scf.if %2 {
      %cst_50 = arith.constant 0.000000e+00 : f32
      %99 = vector.broadcast %cst_50 : f32 to vector<1x1x10xf32>
      %c0_51 = arith.constant 0 : index
      %c0_52 = arith.constant 0 : index
      %c0_53 = arith.constant 0 : index
      %100 = vector.load %arg8[%c0_51, %c0_52, %c0_53] : memref<1x1x10xf32, #tpu.memory_space<vmem>>, vector<1x1x10xf32>
      tpu.vector_store %arg8[%c0_51, %c0_52, %c0_53], %99 {strides = array<i32>} : memref<1x1x10xf32, #tpu.memory_space<vmem>>, vector<1x1x10xf32>,
      %cst_54 = arith.constant 0.000000e+00 : f32
      %101 = vector.broadcast %cst_54 : f32 to vector<1x1x10xf32>
      %c0_55 = arith.constant 0 : index
      %c0_56 = arith.constant 0 : index
      %c0_57 = arith.constant 0 : index
      %102 = vector.load %arg9[%c0_55, %c0_56, %c0_57] : memref<1x1x10xf32, #tpu.memory_space<vmem>>, vector<1x1x10xf32>
      tpu.vector_store %arg9[%c0_55, %c0_56, %c0_57], %101 {strides = array<i32>} : memref<1x1x10xf32, #tpu.memory_space<vmem>>, vector<1x1x10xf32>,
      %cst_58 = arith.constant 0.000000e+00 : f32
      %103 = vector.broadcast %cst_58 : f32 to vector<1x1x15xf32>
      %c0_59 = arith.constant 0 : index
      %c0_60 = arith.constant 0 : index
      %c0_61 = arith.constant 0 : index
      %104 = vector.load %arg10[%c0_59, %c0_60, %c0_61] : memref<1x1x15xf32, #tpu.memory_space<vmem>>, vector<1x1x15xf32>
      tpu.vector_store %arg10[%c0_59, %c0_60, %c0_61], %103 {strides = array<i32>} : memref<1x1x15xf32, #tpu.memory_space<vmem>>, vector<1x1x15xf32>,
      %cst_62 = arith.constant 0.000000e+00 : f32
      %105 = vector.broadcast %cst_62 : f32 to vector<1x1x15xf32>
      %c0_63 = arith.constant 0 : index
      %c0_64 = arith.constant 0 : index
      %c0_65 = arith.constant 0 : index
      %106 = vector.load %arg11[%c0_63, %c0_64, %c0_65] : memref<1x1x15xf32, #tpu.memory_space<vmem>>, vector<1x1x15xf32>
      tpu.vector_store %arg11[%c0_63, %c0_64, %c0_65], %105 {strides = array<i32>} : memref<1x1x15xf32, #tpu.memory_space<vmem>>, vector<1x1x15xf32>,
    } else {
    }
    %c1_i32 = arith.constant 1 : i32
    %3 = arith.muli %arg0, %c1_i32 : i32
    %4 = arith.addi %3, %arg1 : i32
    %5 = tpu.iota {dimensions = array<i32: 0>} : vector<8x1xi32>
    %c8_i32 = arith.constant 8 : i32
    %6 = arith.muli %4, %c8_i32 : i32
    %7 = vector.broadcast %6 : i32 to vector<8x1xi32>
    %8 = arith.addi %7, %5 : vector<8x1xi32>
    %c8_i32_1 = arith.constant 8 : i32
    %9 = vector.broadcast %c8_i32_1 : i32 to vector<8x1xi32>
    %10 = arith.cmpi slt, %8, %9 : vector<8x1xi32>
    %c0 = arith.constant 0 : index
    %c0_2 = arith.constant 0 : index
    %11 = vector.load %arg2[%c0, %c0_2] : memref<8x10xf32, #tpu.memory_space<vmem>>, vector<8x10xf32>
    %cst = arith.constant 0.000000e+00 : f32
    %12 = vector.shape_cast %10 : vector<8x1xi1> to vector<8x1xi1>
    %13 = vector.broadcast %12 : vector<8x1xi1> to vector<8x10xi1>
    %14 = vector.broadcast %cst : f32 to vector<8x10xf32>
    %15 = arith.select %13, %11, %14 : vector<8x10xi1>, vector<8x10xf32>
    %c0_3 = arith.constant 0 : index
    %c0_4 = arith.constant 0 : index
    %16 = vector.load %arg4[%c0_3, %c0_4] : memref<1x10xf32, #tpu.memory_space<vmem>>, vector<1x10xf32>
    %c0_5 = arith.constant 0 : index
    %c0_6 = arith.constant 0 : index
    %17 = vector.load %arg3[%c0_5, %c0_6] : memref<1x8xi32, #tpu.memory_space<vmem>>, vector<1x8xi32>
    %18 = tpu.transpose %17, [1, 0] : vector<1x8xi32> -> vector<8x1xi32>
    %19 = tpu.iota {dimensions = array<i32: 1>} : vector<8x10xi32>
    %20 = vector.broadcast %18 : vector<8x1xi32> to vector<8x10xi32>
    %21 = arith.cmpi eq, %19, %20 : vector<8x10xi32>
    %22 = vector.broadcast %10 : vector<8x1xi1> to vector<8x10xi1>
    %23 = arith.andi %21, %22 : vector<8x10xi1>
    %cst_7 = arith.constant dense<0xFF800000> : vector<8xf32>
    %24 = vector.multi_reduction <maximumf>, %15, %cst_7 [1] : vector<8x10xf32> to vector<8xf32>
    %25 = vector.shape_cast %24 : vector<8xf32> to vector<8x1xf32>
    %26 = vector.broadcast %25 : vector<8x1xf32> to vector<8x10xf32>
    %27 = arith.subf %15, %26 : vector<8x10xf32>
    %28 = math.exp %27 : vector<8x10xf32>
    %cst_8 = arith.constant dense<0.000000e+00> : vector<8xf32>
    %29 = vector.multi_reduction <add>, %28, %cst_8 [1] : vector<8x10xf32> to vector<8xf32>
    %30 = vector.shape_cast %29 : vector<8xf32> to vector<8x1xf32>
    %31 = math.log %30 : vector<8x1xf32>
    %32 = arith.addf %25, %31 : vector<8x1xf32>
    %cst_9 = arith.constant 0.000000e+00 : f32
    %33 = vector.shape_cast %16 : vector<1x10xf32> to vector<1x10xf32>
    %34 = vector.broadcast %33 : vector<1x10xf32> to vector<8x10xf32>
    %35 = vector.broadcast %cst_9 : f32 to vector<8x10xf32>
    %36 = arith.select %23, %34, %35 : vector<8x10xi1>, vector<8x10xf32>
    %37 = vector.broadcast %32 : vector<8x1xf32> to vector<8x10xf32>
    %38 = arith.subf %37, %15 : vector<8x10xf32>
    %39 = vector.broadcast %16 : vector<1x10xf32> to vector<8x10xf32>
    %40 = arith.mulf %39, %38 : vector<8x10xf32>
    %cst_10 = arith.constant 0.000000e+00 : f32
    %41 = vector.broadcast %cst_10 : f32 to vector<8x10xf32>
    %42 = arith.select %23, %40, %41 : vector<8x10xi1>, vector<8x10xf32>
    %cst_11 = arith.constant dense<0.000000e+00> : vector<10xf32>
    %43 = vector.multi_reduction <add>, %42, %cst_11 [0] : vector<8x10xf32> to vector<10xf32>
    %44 = vector.shape_cast %43 : vector<10xf32> to vector<1x10xf32>
    %cst_12 = arith.constant dense<0.000000e+00> : vector<10xf32>
    %45 = vector.multi_reduction <add>, %36, %cst_12 [0] : vector<8x10xf32> to vector<10xf32>
    %46 = vector.shape_cast %45 : vector<10xf32> to vector<1x10xf32>
    %c0_13 = arith.constant 0 : index
    %c0_14 = arith.constant 0 : index
    %47 = vector.load %arg5[%c0_13, %c0_14] : memref<8x15xf32, #tpu.memory_space<vmem>>, vector<8x15xf32>
    %cst_15 = arith.constant 0.000000e+00 : f32
    %48 = vector.shape_cast %10 : vector<8x1xi1> to vector<8x1xi1>
    %49 = vector.broadcast %48 : vector<8x1xi1> to vector<8x15xi1>
    %50 = vector.broadcast %cst_15 : f32 to vector<8x15xf32>
    %51 = arith.select %49, %47, %50 : vector<8x15xi1>, vector<8x15xf32>
    %c0_16 = arith.constant 0 : index
    %c0_17 = arith.constant 0 : index
    %52 = vector.load %arg7[%c0_16, %c0_17] : memref<1x15xf32, #tpu.memory_space<vmem>>, vector<1x15xf32>
    %c0_18 = arith.constant 0 : index
    %c0_19 = arith.constant 0 : index
    %53 = vector.load %arg6[%c0_18, %c0_19] : memref<1x8xi32, #tpu.memory_space<vmem>>, vector<1x8xi32>
    %54 = tpu.transpose %53, [1, 0] : vector<1x8xi32> -> vector<8x1xi32>
    %55 = tpu.iota {dimensions = array<i32: 1>} : vector<8x15xi32>
    %56 = vector.broadcast %54 : vector<8x1xi32> to vector<8x15xi32>
    %57 = arith.cmpi eq, %55, %56 : vector<8x15xi32>
    %58 = vector.broadcast %10 : vector<8x1xi1> to vector<8x15xi1>
    %59 = arith.andi %57, %58 : vector<8x15xi1>
    %cst_20 = arith.constant dense<0xFF800000> : vector<8xf32>
    %60 = vector.multi_reduction <maximumf>, %51, %cst_20 [1] : vector<8x15xf32> to vector<8xf32>
    %61 = vector.shape_cast %60 : vector<8xf32> to vector<8x1xf32>
    %62 = vector.broadcast %61 : vector<8x1xf32> to vector<8x15xf32>
    %63 = arith.subf %51, %62 : vector<8x15xf32>
    %64 = math.exp %63 : vector<8x15xf32>
    %cst_21 = arith.constant dense<0.000000e+00> : vector<8xf32>
    %65 = vector.multi_reduction <add>, %64, %cst_21 [1] : vector<8x15xf32> to vector<8xf32>
    %66 = vector.shape_cast %65 : vector<8xf32> to vector<8x1xf32>
    %67 = math.log %66 : vector<8x1xf32>
    %68 = arith.addf %61, %67 : vector<8x1xf32>
    %cst_22 = arith.constant 0.000000e+00 : f32
    %69 = vector.shape_cast %52 : vector<1x15xf32> to vector<1x15xf32>
    %70 = vector.broadcast %69 : vector<1x15xf32> to vector<8x15xf32>
    %71 = vector.broadcast %cst_22 : f32 to vector<8x15xf32>
    %72 = arith.select %59, %70, %71 : vector<8x15xi1>, vector<8x15xf32>
    %73 = vector.broadcast %68 : vector<8x1xf32> to vector<8x15xf32>
    %74 = arith.subf %73, %51 : vector<8x15xf32>
    %75 = vector.broadcast %52 : vector<1x15xf32> to vector<8x15xf32>
    %76 = arith.mulf %75, %74 : vector<8x15xf32>
    %cst_23 = arith.constant 0.000000e+00 : f32
    %77 = vector.broadcast %cst_23 : f32 to vector<8x15xf32>
    %78 = arith.select %59, %76, %77 : vector<8x15xi1>, vector<8x15xf32>
    %cst_24 = arith.constant dense<0.000000e+00> : vector<15xf32>
    %79 = vector.multi_reduction <add>, %78, %cst_24 [0] : vector<8x15xf32> to vector<15xf32>
    %80 = vector.shape_cast %79 : vector<15xf32> to vector<1x15xf32>
    %cst_25 = arith.constant dense<0.000000e+00> : vector<15xf32>
    %81 = vector.multi_reduction <add>, %72, %cst_25 [0] : vector<8x15xf32> to vector<15xf32>
    %82 = vector.shape_cast %81 : vector<15xf32> to vector<1x15xf32>
    %c0_26 = arith.constant 0 : index
    %c0_27 = arith.constant 0 : index
    %c0_28 = arith.constant 0 : index
    %83 = vector.load %arg8[%c0_26, %c0_27, %c0_28] : memref<1x1x10xf32, #tpu.memory_space<vmem>>, vector<1x1x10xf32>
    %84 = vector.shape_cast %44 : vector<1x10xf32> to vector<1x1x10xf32>
    %85 = arith.addf %83, %84 : vector<1x1x10xf32>
    %c0_29 = arith.constant 0 : index
    %c0_30 = arith.constant 0 : index
    %c0_31 = arith.constant 0 : index
    %86 = vector.load %arg8[%c0_29, %c0_30, %c0_31] : memref<1x1x10xf32, #tpu.memory_space<vmem>>, vector<1x1x10xf32>
    tpu.vector_store %arg8[%c0_29, %c0_30, %c0_31], %85 {strides = array<i32>} : memref<1x1x10xf32, #tpu.memory_space<vmem>>, vector<1x1x10xf32>,
    %c0_32 = arith.constant 0 : index
    %c0_33 = arith.constant 0 : index
    %c0_34 = arith.constant 0 : index
    %87 = vector.load %arg9[%c0_32, %c0_33, %c0_34] : memref<1x1x10xf32, #tpu.memory_space<vmem>>, vector<1x1x10xf32>
    %88 = vector.shape_cast %46 : vector<1x10xf32> to vector<1x1x10xf32>
    %89 = arith.addf %87, %88 : vector<1x1x10xf32>
    %c0_35 = arith.constant 0 : index
    %c0_36 = arith.constant 0 : index
    %c0_37 = arith.constant 0 : index
    %90 = vector.load %arg9[%c0_35, %c0_36, %c0_37] : memref<1x1x10xf32, #tpu.memory_space<vmem>>, vector<1x1x10xf32>
    tpu.vector_store %arg9[%c0_35, %c0_36, %c0_37], %89 {strides = array<i32>} : memref<1x1x10xf32, #tpu.memory_space<vmem>>, vector<1x1x10xf32>,
    %c0_38 = arith.constant 0 : index
    %c0_39 = arith.constant 0 : index
    %c0_40 = arith.constant 0 : index
    %91 = vector.load %arg10[%c0_38, %c0_39, %c0_40] : memref<1x1x15xf32, #tpu.memory_space<vmem>>, vector<1x1x15xf32>
    %92 = vector.shape_cast %80 : vector<1x15xf32> to vector<1x1x15xf32>
    %93 = arith.addf %91, %92 : vector<1x1x15xf32>
    %c0_41 = arith.constant 0 : index
    %c0_42 = arith.constant 0 : index
    %c0_43 = arith.constant 0 : index
    %94 = vector.load %arg10[%c0_41, %c0_42, %c0_43] : memref<1x1x15xf32, #tpu.memory_space<vmem>>, vector<1x1x15xf32>
    tpu.vector_store %arg10[%c0_41, %c0_42, %c0_43], %93 {strides = array<i32>} : memref<1x1x15xf32, #tpu.memory_space<vmem>>, vector<1x1x15xf32>,
    %c0_44 = arith.constant 0 : index
    %c0_45 = arith.constant 0 : index
    %c0_46 = arith.constant 0 : index
    %95 = vector.load %arg11[%c0_44, %c0_45, %c0_46] : memref<1x1x15xf32, #tpu.memory_space<vmem>>, vector<1x1x15xf32>
    %96 = vector.shape_cast %82 : vector<1x15xf32> to vector<1x1x15xf32>
    %97 = arith.addf %95, %96 : vector<1x1x15xf32>
    %c0_47 = arith.constant 0 : index
    %c0_48 = arith.constant 0 : index
    %c0_49 = arith.constant 0 : index
    %98 = vector.load %arg11[%c0_47, %c0_48, %c0_49] : memref<1x1x15xf32, #tpu.memory_space<vmem>>, vector<1x1x15xf32>
    tpu.vector_store %arg11[%c0_47, %c0_48, %c0_49], %97 {strides = array<i32>} : memref<1x1x15xf32, #tpu.memory_space<vmem>>, vector<1x1x15xf32>,
    return
  }
  func.func @transform_0(%arg0: i32, %arg1: i32) -> (i32, i32) {
    %c1_i32 = arith.constant 1 : i32
    %0 = arith.muli %arg0, %c1_i32 : i32
    %1 = arith.addi %0, %arg1 : i32
    %c0_i32 = arith.constant 0 : i32
    %2 = arith.minsi %1, %c0_i32 : i32
    %c0_i32_0 = arith.constant 0 : i32
    %c0_i32_1 = arith.constant 0 : i32
    return %2, %c0_i32_0 : i32, i32
  }
  func.func @transform_1(%arg0: i32, %arg1: i32) -> (i32, i32) {
    %c1_i32 = arith.constant 1 : i32
    %0 = arith.muli %arg0, %c1_i32 : i32
    %1 = arith.addi %0, %arg1 : i32
    %c0_i32 = arith.constant 0 : i32
    %2 = arith.minsi %1, %c0_i32 : i32
    %c0_i32_0 = arith.constant 0 : i32
    %c0_i32_1 = arith.constant 0 : i32
    return %c0_i32_0, %2 : i32, i32
  }
  func.func @transform_2(%arg0: i32, %arg1: i32) -> (i32, i32) {
    %c0_i32 = arith.constant 0 : i32
    %c0_i32_0 = arith.constant 0 : i32
    %c0_i32_1 = arith.constant 0 : i32
    return %c0_i32, %c0_i32_0 : i32, i32
  }
  func.func @transform_3(%arg0: i32, %arg1: i32) -> (i32, i32) {
    %c1_i32 = arith.constant 1 : i32
    %0 = arith.muli %arg0, %c1_i32 : i32
    %1 = arith.addi %0, %arg1 : i32
    %c0_i32 = arith.constant 0 : i32
    %2 = arith.minsi %1, %c0_i32 : i32
    %c0_i32_0 = arith.constant 0 : i32
    %c0_i32_1 = arith.constant 0 : i32
    return %2, %c0_i32_0 : i32, i32
  }
  func.func @transform_4(%arg0: i32, %arg1: i32) -> (i32, i32) {
    %c1_i32 = arith.constant 1 : i32
    %0 = arith.muli %arg0, %c1_i32 : i32
    %1 = arith.addi %0, %arg1 : i32
    %c0_i32 = arith.constant 0 : i32
    %2 = arith.minsi %1, %c0_i32 : i32
    %c0_i32_0 = arith.constant 0 : i32
    %c0_i32_1 = arith.constant 0 : i32
    return %c0_i32_0, %2 : i32, i32
  }
  func.func @transform_5(%arg0: i32, %arg1: i32) -> (i32, i32) {
    %c0_i32 = arith.constant 0 : i32
    %c0_i32_0 = arith.constant 0 : i32
    %c0_i32_1 = arith.constant 0 : i32
    return %c0_i32, %c0_i32_0 : i32, i32
  }
  func.func @transform_6(%arg0: i32, %arg1: i32) -> (i32, i32, i32) {
    %c0_i32 = arith.constant 0 : i32
    %c0_i32_0 = arith.constant 0 : i32
    %c0_i32_1 = arith.constant 0 : i32
    return %arg0, %c0_i32, %c0_i32_0 : i32, i32, i32
  }
  func.func @transform_7(%arg0: i32, %arg1: i32) -> (i32, i32, i32) {
    %c0_i32 = arith.constant 0 : i32
    %c0_i32_0 = arith.constant 0 : i32
    %c0_i32_1 = arith.constant 0 : i32
    return %arg0, %c0_i32, %c0_i32_0 : i32, i32, i32
  }
  func.func @transform_8(%arg0: i32, %arg1: i32) -> (i32, i32, i32) {
    %c0_i32 = arith.constant 0 : i32
    %c0_i32_0 = arith.constant 0 : i32
    %c0_i32_1 = arith.constant 0 : i32
    return %arg0, %c0_i32, %c0_i32_0 : i32, i32, i32
  }
  func.func @transform_9(%arg0: i32, %arg1: i32) -> (i32, i32, i32) {
    %c0_i32 = arith.constant 0 : i32
    %c0_i32_0 = arith.constant 0 : i32
    %c0_i32_1 = arith.constant 0 : i32
    return %arg0, %c0_i32, %c0_i32_0 : i32, i32, i32
  }
}

</mosaic_0001>

<bundles_post_ra>
// kernel: multi_task_loss.1
= control target key start
LH: loop header
LB: loop body
LE: loop exit
PB: predicated region body
PF: predicated region fallthrough
CT: control target
= control target key end

     0   :  { %15 = vsyncpa [#allocation3], 0  ;;  %s381_s30 = smov [#allocation2]   ;;  %s518_s0 = inlined_call_operand.hbm [shape: f32[8,10], index: 0, kind: input, shape index: {}]   ;;  %s519_s1 = inlined_call_operand.vmem [shape: s32[1,8], index: 1, kind: input, shape index: {}]   ;;  %s520_s2 = inlined_call_operand.vmem [shape: f32[1,10], index: 2, kind: input, shape index: {}]   ;;  %s521_s3 = inlined_call_operand.vmem [shape: f32[8,15], index: 3, kind: input, shape index: {}]   ;;  %s522_s4 = inlined_call_operand.vmem [shape: s32[1,8], index: 4, kind: input, shape index: {}]   ;;  %s523_s5 = inlined_call_operand.vmem [shape: f32[1,15], index: 5, kind: input, shape index: {}]   ;;  %s524_s6 = inlined_call_operand.vmem [shape: f32[1,1,10], index: 6, kind: output, shape index: {0}]   ;;  %s525_s7 = inlined_call_operand.vmem [shape: f32[1,1,10], index: 7, kind: output, shape index: {1}]   ;;  %s526_s8 = inlined_call_operand.vmem [shape: f32[1,1,15], index: 8, kind: output, shape index: {2}]   ;;  %s527_s9 = inlined_call_operand.vmem [shape: f32[1,1,15], index: 9, kind: output, shape index: {3}]  }
   0x1   :  { %s27_s10 = sshll.u32 %s381_s30, 4  ;;  %s28_s10 = int_to_ptr.vmem [resolvable:$true] %s27_s10 }
   0x2   :  { %s367_s11 = scalar_lea.vmem %s28_s10, 128  ;;  %p372_p1 = scmp.lt.s32.totalorder %s28_s10, %s28_s10 }
   0x3   :  { %p368_p0 = scmp.ne.s32.totalorder %s28_s10, %s367_s11  ;;  %p373_p2 = scmp.lt.s32.totalorder %s367_s11, %s367_s11 }
   0x5   :  { %p374_p3 = por %p373_p2, %p372_p1 }
   0x7   :  { %p375_p4 = pnand %p374_p3, %p368_p0 }
   0x9   :  { %378 = shalt.err (!%p375_p4)
}
   0xa   :  { %30 = dma.hbm_to_vmem [thread:$0]  %s518_s0, 128, %s28_s10, [#allocation3]  }
   0xb   :  { %379 = dma.done.wait [#allocation3], 128  }
   0xc   :  { %380 = vsyncadd [#allocation3], 4294967168  ;;  %vm184_vm0 = vcmask 80896   ;;  %v437_v0 = vld [vmem:[#allocation2] sm:$0xff]  ;;  %vm262_vm1 = vcmask 121856   ;;  %v382_v6 = vmov 0   ;;  %v177_v21 = vlaneseq }
   0xd   :  { %v442_v1 = vld [vmem:[%s521_s3] sm:$0xff]  ;;  %v185_v3 = vsel %vm184_vm0, %v437_v0, -inf  ;;  %349 = vset.pattern.permute.xlu0 %v382_v6  ;;  %vm126_vm2 = vcmask 73728   ;;  %v383_v19 = vmov 0.0   ;;  %vm129_vm3 = vcmask 114688  }
   0xe   :  { %v144_v2 = vld [vmem:[%s519_s1] sm:$0x1]  ;;  %186 = vmax.xlane.f32.xlu0 %v185_v3  ;;  %v263_v5 = vsel %vm262_vm1, %v442_v1, -inf  ;;  %127 = vst.msk [vmem:[%s524_s6] sm:$0x1] %vm126_vm2, %v383_v19  ;;  %v178_v23 = vand.u32 127, %v177_v21 }
   0xf   :  { %145 = vxpose.xlu1.b32.start.end [1/1] (short) (narrow) %v144_v2, 8  ;;  %v224_v4 = vld [vmem:[%s522_s4] sm:$0x1]  ;;  %128 = vst.msk [vmem:[%s525_s7] sm:$0x1] %vm126_vm2, %v383_v19 }
  0x10   :  { %130 = vst.msk [vmem:[%s526_s8] sm:$0x1] %vm129_vm3, %v383_v19  ;;  %131 = vst.msk [vmem:[%s527_s9] sm:$0x1] %vm129_vm3, %v383_v19  ;;  %v344_v24 = vld [vmem:[%s520_s2] ss:$0 sm:$0xff] }
  0x11   :  { %v345_v25 = vld [vmem:[%s523_s5] ss:$0 sm:$0xff] }
  0x12   :  { %264 = vmax.xlane.f32.xlu0 %v263_v5 }
  0x13   :  { %225 = vxpose.xlu1.b32.start.end [1/1] (short) (narrow) %v224_v4, 8 }
  0x16   :  { %v303_v50 = vld [vmem:[%s525_s7] sm:$0x1] }
  0x17   :  { %v310_v51 = vld [vmem:[%s527_s9] sm:$0x1] }
  0x31   :  { %350 = vset.pattern.permute.xlu1 %v382_v6  ;;  %v299_v6 = vld [vmem:[%s524_s6] sm:$0x1] }
  0x8b   :  { %v161_v17 = vpop.trf.xlu1 }
  0x8f   :  { %v241_v18 = vpop.trf.xlu1 }
  0x97   :  { %v187_v7 = vpop.xlane.xlu0 %186 }
  0x98   :  { %v188_v8 = vsub.f32 %v437_v0, %v187_v7 }
  0x9a   :  { %v189_v9 = vmul.f32 1.442695, %v188_v8 }
  0x9b   :  { %v265_v10 = vpop.xlane.xlu0 %264 }
  0x9c   :  { %351 = vpow2.f32 %v189_v9  ;;  %v266_v11 = vsub.f32 %v442_v1, %v265_v10 }
  0x9e   :  { %v267_v12 = vmul.f32 1.442695, %v266_v11  ;;  %v306_v11 = vld [vmem:[%s526_s8] sm:$0x1] }
  0xa0   :  { %353 = vpow2.f32 %v267_v12 }
  0xa9   :  { %v352_v13 = vpop.eup %351 }
  0xaa   :  { %v191_v14 = vsel %vm184_vm0, %v352_v13, 0.0 }
  0xab   :  { %192 = vadd.xlane.f32.xlu0 %v191_v14 }
  0xad   :  { %v354_v15 = vpop.eup %353 }
  0xae   :  { %v269_v16 = vsel %vm262_vm1, %v354_v15, 0.0 }
  0xaf   :  { %270 = vadd.xlane.f32.xlu1 %v269_v16 }
  0xc0   :  { %258 = vperm.xlu1 %350, %v241_v18  }
  0xc1   :  { %180 = vperm.xlu0 %349, %v161_v17  }
 0x134   :  { %v193_v20 = vpop.xlane.xlu0 %192 }
 0x135   :  { %355 = vlog2.f32 %v193_v20 }
 0x138   :  { %v271_v22 = vpop.xlane.xlu1 %270 }
 0x139   :  { %357 = vlog2.f32 %v271_v22 }
 0x13c   :  { %v181_v26 = vpop.permute.xlu0 %180  ;;  %v259_v27 = vpop.permute.xlu1 %258 }
 0x13d   :  { %vm182_vm4 = vcmp.eq.s32.totalorder %v178_v23, %v181_v26  ;;  %vm260_vm5 = vcmp.eq.s32.totalorder %v178_v23, %v259_v27 }
 0x13e   :  { %v203_v28 = vsel %vm182_vm4, %v344_v24, 0.0  ;;  %v281_v29 = vsel %vm260_vm5, %v345_v25, 0.0 }
 0x13f   :  { %v214_v30 = vsel %vm184_vm0, %v203_v28, 0.0  ;;  %v292_v31 = vsel %vm262_vm1, %v281_v29, 0.0 }
 0x140   :  { %v215_v32 = vrot.slane %v214_v30, 4  ;;  %v293_v33 = vrot.slane %v292_v31, 4 }
 0x142   :  { %v356_v34 = vpop.eup %355  ;;  %v216_v35 = vadd.f32 %v215_v32, %v214_v30  ;;  %v294_v36 = vadd.f32 %v293_v33, %v292_v31 }
 0x143   :  { %v195_v37 = vmul.f32 0.6931472, %v356_v34 }
 0x144   :  { %v217_v38 = vrot.slane %v216_v35, 2  ;;  %v295_v39 = vrot.slane %v294_v36, 2 }
 0x145   :  { %v196_v40 = vadd.f32 %v195_v37, %v187_v7 }
 0x146   :  { %v358_v41 = vpop.eup %357  ;;  %v218_v42 = vadd.f32 %v217_v38, %v216_v35  ;;  %v296_v43 = vadd.f32 %v295_v39, %v294_v36 }
 0x147   :  { %v273_v44 = vmul.f32 0.6931472, %v358_v41  ;;  %v204_v45 = vsub.f32 %v196_v40, %v437_v0 }
 0x148   :  { %v219_v46 = vrot.slane %v218_v42, 1  ;;  %v297_v47 = vrot.slane %v296_v43, 1 }
 0x149   :  { %v274_v48 = vadd.f32 %v273_v44, %v265_v10  ;;  %v205_v49 = vmul.f32 %v344_v24, %v204_v45 }
 0x14a   :  { %v220_v52 = vadd.f32 %v219_v46, %v218_v42  ;;  %v298_v53 = vadd.f32 %v297_v47, %v296_v43 }
 0x14b   :  { %v206_v54 = vsel %vm182_vm4, %v205_v49, 0.0  ;;  %v282_v55 = vsub.f32 %v274_v48, %v442_v1 }
 0x14c   :  { %v207_v56 = vsel %vm184_vm0, %v206_v54, 0.0  ;;  %v304_v57 = vadd.f32 %v303_v50, %v220_v52  ;;  %v311_v58 = vadd.f32 %v310_v51, %v298_v53 }
 0x14d   :  { %v208_v59 = vrot.slane %v207_v56, 4  ;;  %v283_v60 = vmul.f32 %v345_v25, %v282_v55 }
 0x14e   :  { %305 = vst.msk [vmem:[%s525_s7] sm:$0x1] %vm126_vm2, %v304_v57 }
 0x14f   :  { %312 = vst.msk [vmem:[%s527_s9] sm:$0x1] %vm129_vm3, %v311_v58  ;;  %v209_v61 = vadd.f32 %v208_v59, %v207_v56  ;;  %v284_v62 = vsel %vm260_vm5, %v283_v60, 0.0 }
 0x150   :  { %v285_v63 = vsel %vm262_vm1, %v284_v62, 0.0 }
 0x151   :  { %v210_v0 = vrot.slane %v209_v61, 2  ;;  %v286_v1 = vrot.slane %v285_v63, 4 }
 0x153   :  { %v211_v2 = vadd.f32 %v210_v0, %v209_v61  ;;  %v287_v3 = vadd.f32 %v286_v1, %v285_v63 }
 0x155   :  { %v212_v4 = vrot.slane %v211_v2, 1  ;;  %v288_v5 = vrot.slane %v287_v3, 2 }
 0x157   :  { %v213_v7 = vadd.f32 %v212_v4, %v211_v2  ;;  %v289_v8 = vadd.f32 %v288_v5, %v287_v3 }
 0x159   :  { %v300_v9 = vadd.f32 %v299_v6, %v213_v7  ;;  %v290_v10 = vrot.slane %v289_v8, 1 }
 0x15b   :  { %302 = vst.msk [vmem:[%s524_s6] sm:$0x1] %vm126_vm2, %v300_v9  ;;  %v291_v12 = vadd.f32 %v290_v10, %v289_v8 }
 0x15d   :  { %v307_v13 = vadd.f32 %v306_v11, %v291_v12 }
 0x15f   :  { %309 = vst.msk [vmem:[%s526_s8] sm:$0x1] %vm129_vm3, %v307_v13 }
 0x160   :  { %329 = vsyncpa [#allocation3], 1 }

</bundles_post_ra>
